<compile_context>
chip_gen: v6e
topology: v6e:2x2x1
jax: 0.10.0
libtpu: 0.0.40
codegen_flags: <defaults>
</compile_context>

<pallas_src>
import functools

import jax
import jax.numpy as jnp
from jax import lax
from jax.experimental import pallas as pl
from jax.experimental.pallas import tpu as pltpu


def _round_up(a, m):
    return ((a + m - 1) // m) * m


def _device_kind():
    try:
        return jax.devices()[0].device_kind.lower()
    except Exception:
        return ""


def mlp_kernel(x_ref, w1t_ref, b1_ref, w2t_ref, b2_ref, w3_ref, b3_ref, o_ref,
               *, use_bf16):
    """Fused 3-layer MLP on one batch tile, batch-in-lanes. o_ref is (1, TB)."""
    x = x_ref[...]                        # (TB, D)
    w1t = w1t_ref[...]                    # (64, D)
    w2t = w2t_ref[...]                    # (32, 64)
    if use_bf16:                          # bf16-native MXU on v6e/v7x; f32 accum
        x = x.astype(jnp.bfloat16)
        w1t = w1t.astype(jnp.bfloat16)
        w2t = w2t.astype(jnp.bfloat16)

    # h1 = W1 @ x^T: contract the feature axis of both operands so the result
    # (64, TB) keeps batch in lanes -- no explicit transpose of the x tile.
    h1 = lax.dot_general(w1t, x, (((1,), (1,)), ((), ())),
                         preferred_element_type=jnp.float32)
    h1 = jnp.maximum(h1 + b1_ref[...], 0.0)            # (64, TB), full-lane VPU
    if use_bf16:
        h1 = h1.astype(jnp.bfloat16)

    h2 = jnp.dot(w2t, h1, preferred_element_type=jnp.float32)
    h2 = jnp.maximum(h2 + b2_ref[...], 0.0)            # (32, TB)

    # Linear(32, 1): VPU multiply + sublane reduce (XLU slot) -- keeps the MXU
    # off a pathological N=1 matmul and the result is already the lane-dense
    # (1, TB) output row (no reshape/relayout before the store).
    y = jnp.sum(h2 * w3_ref[...], axis=0, keepdims=True) + b3_ref[...]
    o_ref[...] = y.astype(o_ref.dtype)


@functools.partial(jax.jit, static_argnames=("tile_b", "use_bf16", "multi_tc"))
def _forward(x, params, tile_b, use_bf16, multi_tc):
    w1, b1, w2, b2, w3, b3 = params
    B, D = x.shape
    H1 = w1.shape[1]   # 64
    H2 = w2.shape[1]   # 32
    itemsize = jnp.dtype(x.dtype).itemsize

    # ---- batch tile: 128-aligned so output rows are unmasked full-lane stores
    # and the MXU result dim is a multiple of the systolic width. (128-multiples
    # also satisfy the packed-sublane constraint for bf16/int8 inputs.)
    B_aligned = _round_up(B, 128)
    tb = _round_up(min(int(tile_b), B_aligned), 128)
    # cap so the double-buffered x tile stays <= ~8 MiB total (safe on v7x's
    # 64 MiB VMEM / 32 MiB scoped default, generous on v5e/v6e).
    tb_cap = max(128, ((8 * 1024 * 1024) // (2 * D * itemsize)) // 128 * 128)
    tb = min(tb, tb_cap)
    # only split the batch for parallelism on multi-TensorCore chips (v7x);
    # on single-TC v5e/v6e the grid is a serial loop.
    if multi_tc and B_aligned >= 256:
        half = max(128, _round_up(pl.cdiv(B_aligned, 2), 128))
        tb = min(tb, half)

    num_tiles = pl.cdiv(B, tb)
    B_padded = num_tiles * tb
    if B_padded != B:
        x = jnp.pad(x, ((0, B_padded - B), (0, 0)))

    # feature-major weights / column biases
    w1t = w1.T                      # (H1, D)
    w2t = w2.T                      # (H2, H1)
    b1c = b1.reshape(H1, 1)
    b2c = b2.reshape(H2, 1)
    w3c = w3.reshape(H2, 1)
    b3c = b3.reshape(1, 1)

    # ---- tight explicit VMEM budget (real need is < 2 MiB for this network) --
    est = (2 * tb * D * itemsize                                   # x (double-buffered)
           + 2 * tb * itemsize                                     # output row (double-buffered)
           + 2 * (H1 * D + H1 + H1 * H2 + 2 * H2 + 1) * itemsize   # weights + biases
           + tb * (H1 + H2 + 1) * 4                                # f32 intermediates
           + (tb * D + tb * H1 + H1 * D + H1 * H2) * 2)            # bf16 copies (if used)
    vmem_limit = int(min(max(2 * est, 4 * 1024 * 1024), 32 * 1024 * 1024))

    kernel = functools.partial(mlp_kernel, use_bf16=use_bf16)

    out = pl.pallas_call(
        kernel,
        out_shape=jax.ShapeDtypeStruct((1, B_padded), x.dtype),
        grid_spec=pltpu.PrefetchScalarGridSpec(
            num_scalar_prefetch=0,
            grid=(num_tiles,),
            in_specs=[
                pl.BlockSpec((tb, D), lambda i: (i, 0)),    # x tile
                pl.BlockSpec((H1, D), lambda i: (0, 0)),    # W1^T (resident)
                pl.BlockSpec((H1, 1), lambda i: (0, 0)),    # b1 column
                pl.BlockSpec((H2, H1), lambda i: (0, 0)),   # W2^T (resident)
                pl.BlockSpec((H2, 1), lambda i: (0, 0)),    # b2 column
                pl.BlockSpec((H2, 1), lambda i: (0, 0)),    # W3 column
                pl.BlockSpec((1, 1), lambda i: (0, 0)),     # b3
            ],
            out_specs=pl.BlockSpec((1, tb), lambda i: (0, i)),   # lane-dense row
        ),
        compiler_params=pltpu.CompilerParams(
            dimension_semantics=("parallel",),
            vmem_limit_bytes=vmem_limit),
    )(x, w1t, b1c, w2t, b2c, w3c, b3c)

    # (1, B_padded) is already in batch order along lanes; drop padding.
    return out[0, :B][:, None]


def regression_nn_forward(x, params, tile_b=2048, use_bf16=None, multi_tc=None):
    kind = _device_kind()
    if use_bf16 is None:
        use_bf16 = ("v6" in kind) or ("v7" in kind)   # bf16-native MXU
    if multi_tc is None:
        multi_tc = "v7" in kind                       # 2 TensorCores / chip
    return _forward(x, params, int(tile_b), bool(use_bf16), bool(multi_tc))


def init_params(key, input_dim):
    """Deterministic init mirroring nn.Linear's default (uniform +/- 1/sqrt(fan_in))."""
    dims = [(input_dim, 64), (64, 32), (32, 1)]
    params = []
    for (fan_in, fan_out) in dims:
        key, kw, kb = jax.random.split(key, 3)
        bound = 1.0 / jnp.sqrt(fan_in)
        w = jax.random.uniform(kw, (fan_in, fan_out), jnp.float32, -bound, bound)
        b = jax.random.uniform(kb, (1, fan_out), jnp.float32, -bound, bound)
        params.extend([w, b])
    return tuple(params)


def reference_forward(x, params):
    w1, b1, w2, b2, w3, b3 = params
    h1 = jnp.maximum(x @ w1 + b1, 0.0)
    h2 = jnp.maximum(h1 @ w2 + b2, 0.0)
    return h2 @ w3 + b3


if __name__ == "__main__":
    key = jax.random.PRNGKey(0)
    k_params, k_x, k_x2, k_x3 = jax.random.split(key, 4)

    input_dim = 32
    params = init_params(k_params, input_dim)

    kind = _device_kind()
    bf16_mxu = ("v6" in kind) or ("v7" in kind)
    tol = 5e-2 if bf16_mxu else 1e-5   # bf16 MXU operands change numerics slightly

    # small example consistent with the module
    batch = 8
    x = jax.random.normal(k_x, (batch, input_dim), jnp.float32)
    out = jax.block_until_ready(regression_nn_forward(x, params))
    ref = reference_forward(x, params)
    assert out.shape == (batch, 1)
    assert jnp.allclose(out, ref, atol=tol, rtol=tol), "mismatch vs reference (batch=8)"

    # ragged batch exercises the zero-padding path
    batch2 = 20
    x2 = jax.random.normal(k_x2, (batch2, input_dim), jnp.float32)
    out2 = jax.block_until_ready(regression_nn_forward(x2, params))
    ref2 = reference_forward(x2, params)
    assert out2.shape == (batch2, 1)
    assert jnp.allclose(out2, ref2, atol=tol, rtol=tol), "mismatch vs reference (batch=20)"

    # small forced-tile run exercises the multi-grid-step (>=2 tiles) path
    batch3 = 260
    x3 = jax.random.normal(k_x3, (batch3, input_dim), jnp.float32)
    out3 = jax.block_until_ready(regression_nn_forward(x3, params, tile_b=128))
    ref3 = reference_forward(x3, params)
    assert out3.shape == (batch3, 1)
    assert jnp.allclose(out3, ref3, atol=tol, rtol=tol), "mismatch vs reference (batch=260)"

    print("KERNEL_OK")
</pallas_src>

<mosaic_0001>
module attributes {stable_mosaic.version = 11 : i64} {
  func.func @mlp_kernel(%arg0: i32, %arg1: memref<128x32xf32, #tpu.memory_space<vmem>>, %arg2: memref<64x32xf32, #tpu.memory_space<vmem>>, %arg3: memref<64x1xf32, #tpu.memory_space<vmem>>, %arg4: memref<32x64xf32, #tpu.memory_space<vmem>>, %arg5: memref<32x1xf32, #tpu.memory_space<vmem>>, %arg6: memref<32x1xf32, #tpu.memory_space<vmem>>, %arg7: memref<1x1xf32, #tpu.memory_space<vmem>>, %arg8: memref<1x128xf32, #tpu.memory_space<vmem>>) attributes {dimension_semantics = [#tpu.dimension_semantics<parallel>], iteration_bounds = array<i64: 1>, scalar_prefetch = 0 : i64, scratch_operands = 0 : i64, tpu.core_type = #tpu.core_type<tc>, window_params = [{transform_indices = @transform_0, window_bounds = array<i64: 128, 32>}, {pipeline_mode = #tpu.pipeline_mode<synchronous>, transform_indices = @transform_1, window_bounds = array<i64: 64, 32>}, {pipeline_mode = #tpu.pipeline_mode<synchronous>, transform_indices = @transform_2, window_bounds = array<i64: 64, 1>}, {pipeline_mode = #tpu.pipeline_mode<synchronous>, transform_indices = @transform_3, window_bounds = array<i64: 32, 64>}, {pipeline_mode = #tpu.pipeline_mode<synchronous>, transform_indices = @transform_4, window_bounds = array<i64: 32, 1>}, {pipeline_mode = #tpu.pipeline_mode<synchronous>, transform_indices = @transform_5, window_bounds = array<i64: 32, 1>}, {pipeline_mode = #tpu.pipeline_mode<synchronous>, transform_indices = @transform_6, window_bounds = array<i64: 1, 1>}, {transform_indices = @transform_7, window_bounds = array<i64: 1, 128>}]} {
    %c0 = arith.constant 0 : index
    %c0_0 = arith.constant 0 : index
    %0 = vector.load %arg1[%c0, %c0_0] : memref<128x32xf32, #tpu.memory_space<vmem>>, vector<128x32xf32>
    %c0_1 = arith.constant 0 : index
    %c0_2 = arith.constant 0 : index
    %1 = vector.load %arg2[%c0_1, %c0_2] : memref<64x32xf32, #tpu.memory_space<vmem>>, vector<64x32xf32>
    %c0_3 = arith.constant 0 : index
    %c0_4 = arith.constant 0 : index
    %2 = vector.load %arg4[%c0_3, %c0_4] : memref<32x64xf32, #tpu.memory_space<vmem>>, vector<32x64xf32>
    %cst = arith.constant dense<0.000000e+00> : vector<64x128xf32>
    %3 = tpu.matmul %1, %0, %cst {dimension_numbers = #tpu.dot_dimension_numbers<[1], [1], [0], [0], [0, 0, 1, 0], [], []>} : vector<64x32xf32>, vector<128x32xf32>, vector<64x128xf32> -> vector<64x128xf32>
    %c0_5 = arith.constant 0 : index
    %c0_6 = arith.constant 0 : index
    %4 = vector.load %arg3[%c0_5, %c0_6] : memref<64x1xf32, #tpu.memory_space<vmem>>, vector<64x1xf32>
    %5 = vector.broadcast %4 : vector<64x1xf32> to vector<64x128xf32>
    %6 = arith.addf %3, %5 : vector<64x128xf32>
    %cst_7 = arith.constant 0.000000e+00 : f32
    %7 = vector.broadcast %cst_7 : f32 to vector<64x128xf32>
    %8 = arith.maximumf %6, %7 : vector<64x128xf32>
    %cst_8 = arith.constant dense<0.000000e+00> : vector<32x128xf32>
    %9 = tpu.matmul %2, %8, %cst_8 {dimension_numbers = #tpu.dot_dimension_numbers<[1], [0], [0], [1], [0, 0, 1, 1], [], []>} : vector<32x64xf32>, vector<64x128xf32>, vector<32x128xf32> -> vector<32x128xf32>
    %c0_9 = arith.constant 0 : index
    %c0_10 = arith.constant 0 : index
    %10 = vector.load %arg5[%c0_9, %c0_10] : memref<32x1xf32, #tpu.memory_space<vmem>>, vector<32x1xf32>
    %11 = vector.broadcast %10 : vector<32x1xf32> to vector<32x128xf32>
    %12 = arith.addf %9, %11 : vector<32x128xf32>
    %cst_11 = arith.constant 0.000000e+00 : f32
    %13 = vector.broadcast %cst_11 : f32 to vector<32x128xf32>
    %14 = arith.maximumf %12, %13 : vector<32x128xf32>
    %c0_12 = arith.constant 0 : index
    %c0_13 = arith.constant 0 : index
    %15 = vector.load %arg6[%c0_12, %c0_13] : memref<32x1xf32, #tpu.memory_space<vmem>>, vector<32x1xf32>
    %16 = vector.broadcast %15 : vector<32x1xf32> to vector<32x128xf32>
    %17 = arith.mulf %14, %16 : vector<32x128xf32>
    %cst_14 = arith.constant dense<0.000000e+00> : vector<128xf32>
    %18 = vector.multi_reduction <add>, %17, %cst_14 [0] : vector<32x128xf32> to vector<128xf32>
    %19 = vector.shape_cast %18 : vector<128xf32> to vector<1x128xf32>
    %c0_15 = arith.constant 0 : index
    %c0_16 = arith.constant 0 : index
    %20 = vector.load %arg7[%c0_15, %c0_16] : memref<1x1xf32, #tpu.memory_space<vmem>>, vector<1x1xf32>
    %21 = vector.broadcast %20 : vector<1x1xf32> to vector<1x128xf32>
    %22 = arith.addf %19, %21 : vector<1x128xf32>
    %c0_17 = arith.constant 0 : index
    %c0_18 = arith.constant 0 : index
    %23 = vector.load %arg8[%c0_17, %c0_18] : memref<1x128xf32, #tpu.memory_space<vmem>>, vector<1x128xf32>
    tpu.vector_store %arg8[%c0_17, %c0_18], %22 {strides = array<i32>} : memref<1x128xf32, #tpu.memory_space<vmem>>, vector<1x128xf32>,
    return
  }
  func.func @transform_0(%arg0: i32) -> (i32, i32) {
    %c0_i32 = arith.constant 0 : i32
    %c0_i32_0 = arith.constant 0 : i32
    return %arg0, %c0_i32 : i32, i32
  }
  func.func @transform_1(%arg0: i32) -> (i32, i32) {
    %c0_i32 = arith.constant 0 : i32
    %c0_i32_0 = arith.constant 0 : i32
    %c0_i32_1 = arith.constant 0 : i32
    return %c0_i32, %c0_i32_0 : i32, i32
  }
  func.func @transform_2(%arg0: i32) -> (i32, i32) {
    %c0_i32 = arith.constant 0 : i32
    %c0_i32_0 = arith.constant 0 : i32
    %c0_i32_1 = arith.constant 0 : i32
    return %c0_i32, %c0_i32_0 : i32, i32
  }
  func.func @transform_3(%arg0: i32) -> (i32, i32) {
    %c0_i32 = arith.constant 0 : i32
    %c0_i32_0 = arith.constant 0 : i32
    %c0_i32_1 = arith.constant 0 : i32
    return %c0_i32, %c0_i32_0 : i32, i32
  }
  func.func @transform_4(%arg0: i32) -> (i32, i32) {
    %c0_i32 = arith.constant 0 : i32
    %c0_i32_0 = arith.constant 0 : i32
    %c0_i32_1 = arith.constant 0 : i32
    return %c0_i32, %c0_i32_0 : i32, i32
  }
  func.func @transform_5(%arg0: i32) -> (i32, i32) {
    %c0_i32 = arith.constant 0 : i32
    %c0_i32_0 = arith.constant 0 : i32
    %c0_i32_1 = arith.constant 0 : i32
    return %c0_i32, %c0_i32_0 : i32, i32
  }
  func.func @transform_6(%arg0: i32) -> (i32, i32) {
    %c0_i32 = arith.constant 0 : i32
    %c0_i32_0 = arith.constant 0 : i32
    %c0_i32_1 = arith.constant 0 : i32
    return %c0_i32, %c0_i32_0 : i32, i32
  }
  func.func @transform_7(%arg0: i32) -> (i32, i32) {
    %c0_i32 = arith.constant 0 : i32
    %c0_i32_0 = arith.constant 0 : i32
    return %c0_i32, %arg0 : i32, i32
  }
}

</mosaic_0001>

<bundles_post_ra>
// kernel: _forward.1
= control target key start
LH: loop header
LB: loop body
LE: loop exit
PB: predicated region body
PF: predicated region fallthrough
CT: control target
= control target key end

     0   :  { %vm104_vm0 = vcmask 261120   ;;  %v602_v2 = vmov 0   ;;  %vm314_vm1 = vcmask 523264   ;;  %s825_s0 = inlined_call_operand.vmem [shape: f32[128,32], index: 0, kind: input, shape index: {}]   ;;  %s826_s6 = inlined_call_operand.<no memory space> [shape: f32[1,1], index: 6, kind: input, shape index: {}]   ;;  %s827_s1 = inlined_call_operand.vmem [shape: f32[64,32], index: 1, kind: input, shape index: {}]   ;;  %s828_s2 = inlined_call_operand.vmem [shape: f32[64,1], index: 2, kind: input, shape index: {}]   ;;  %s829_s4 = inlined_call_operand.vmem [shape: f32[32,1], index: 4, kind: input, shape index: {}]   ;;  %s830_s5 = inlined_call_operand.vmem [shape: f32[32,1], index: 5, kind: input, shape index: {}]   ;;  %s831_s3 = inlined_call_operand.vmem [shape: f32[32,64], index: 3, kind: input, shape index: {}]   ;;  %s832_s7 = inlined_call_operand.vmem [shape: f32[1,128], index: 7, kind: output, shape index: {}]  }
   0x1   :  { %v43_v0 = vld [vmem:[%s825_s0 + $0x78] sm:$0xff]  ;;  %v42_v1 = vld [vmem:[%s825_s0 + $0x70] sm:$0xff]  ;;  %600 = vset.pattern.permute.xlu0 %v602_v2  ;;  %601 = vset.pattern.permute.xlu1 %v602_v2  ;;  %v12_v3 = vstv %s826_s6  ;;  %v41_v4 = vld [vmem:[%s825_s0 + $0x68] sm:$0xff] }
   0x2   :  { %533 = vmatprep.subr.msk.mxu0 %vm104_vm0, %v43_v0  ;;  %13 = vst [vmem:[#allocation2] sm:$0x1] %v12_v3  ;;  %v44_v5 = vld [vmem:[%s827_s1] sm:$0xff]  ;;  %v63_v7 = vld [vmem:[%s828_s2 + $0x38] sm:$0xff]  ;;  %v61_v8 = vld [vmem:[%s828_s2 + $0x28] sm:$0xff] }
   0x3   :  { %534 = vmatpush3.xpose.msk.msra.mxu0 %vm104_vm0, %v43_v0  ;;  %565 = vmatprep.mubr.msk.f32.mxu0 %vm104_vm0, %v44_v5  ;;  %v40_v6 = vld [vmem:[%s825_s0 + $0x60] sm:$0xff]  ;;  %v62_v9 = vld [vmem:[%s828_s2 + $0x30] sm:$0xff]  ;;  %v39_v11 = vld [vmem:[%s825_s0 + $0x58] sm:$0xff] }
   0x4   :  { %535 = vmatprep.subr.msk.mxu0 %vm104_vm0, %v42_v1  ;;  %101 = vperm.xlu0 %600, %v63_v7   ;;  %v60_v10 = vld [vmem:[%s828_s2 + $0x20] sm:$0xff]  ;;  %v59_v12 = vld [vmem:[%s828_s2 + $0x18] sm:$0xff]  ;;  %v58_v13 = vld [vmem:[%s828_s2 + $0x10] sm:$0xff] }
   0x5   :  { %91 = vperm.xlu1 %601, %v61_v8   ;;  %v38_v14 = vld [vmem:[%s825_s0 + $0x50] sm:$0xff]  ;;  %v57_v15 = vld [vmem:[%s828_s2 + $0x8] sm:$0xff]  ;;  %v56_v16 = vld [vmem:[%s828_s2] sm:$0xff] }
   0x6   :  { %v37_v17 = vld [vmem:[%s825_s0 + $0x48] sm:$0xff]  ;;  %v290_v18 = vld [vmem:[%s829_s4] sm:$0xff]  ;;  %v292_v21 = vld [vmem:[%s829_s4 + $0x10] sm:$0xff] }
   0x7   :  { %536 = vmatpush3.xpose.msk.msra.mxu0 %vm104_vm0, %v42_v1  ;;  %v291_v19 = vld [vmem:[%s829_s4 + $0x8] sm:$0xff]  ;;  %v36_v20 = vld [vmem:[%s825_s0 + $0x40] sm:$0xff]  ;;  %v293_v22 = vld [vmem:[%s829_s4 + $0x18] sm:$0xff] }
   0x8   :  { %537 = vmatprep.subr.msk.mxu0 %vm104_vm0, %v41_v4  ;;  %96 = vperm.xlu0 %600, %v62_v9   ;;  %v35_v23 = vld [vmem:[%s825_s0 + $0x38] sm:$0xff]  ;;  %v416_v24 = vld [vmem:[%s830_s5] sm:$0xff]  ;;  %v417_v25 = vld [vmem:[%s830_s5 + $0x8] sm:$0xff] }
   0x9   :  { %86 = vperm.xlu1 %601, %v60_v10   ;;  %v34_v26 = vld [vmem:[%s825_s0 + $0x30] sm:$0xff]  ;;  %v419_v28 = vld [vmem:[%s830_s5 + $0x18] sm:$0xff]  ;;  %v33_v29 = vld [vmem:[%s825_s0 + $0x28] sm:$0xff] }
   0xa   :  { %v418_v27 = vld [vmem:[%s830_s5 + $0x10] sm:$0xff]  ;;  %v453_v30 = vld [vmem:[#allocation2] sm:$0x1]  ;;  %v31_v32 = vld [vmem:[%s825_s0 + $0x18] sm:$0xff] }
   0xb   :  { %538 = vmatpush3.xpose.msk.msra.mxu0 %vm104_vm0, %v41_v4  ;;  %v32_v31 = vld [vmem:[%s825_s0 + $0x20] sm:$0xff]  ;;  %v30_v33 = vld [vmem:[%s825_s0 + $0x10] sm:$0xff]  ;;  %v29_v34 = vld [vmem:[%s825_s0 + $0x8] sm:$0xff] }
   0xc   :  { %539 = vmatprep.subr.msk.mxu0 %vm104_vm0, %v40_v6  ;;  %81 = vperm.xlu0 %600, %v59_v12   ;;  %v28_v35 = vld [vmem:[%s825_s0] sm:$0xff]  ;;  %v45_v36 = vld [vmem:[%s827_s1 + $0x8] sm:$0xff]  ;;  %v46_v37 = vld [vmem:[%s827_s1 + $0x10] sm:$0xff] }
   0xd   :  { %76 = vperm.xlu1 %601, %v58_v13   ;;  %v47_v38 = vld [vmem:[%s827_s1 + $0x18] sm:$0xff]  ;;  %v48_v39 = vld [vmem:[%s827_s1 + $0x20] sm:$0xff]  ;;  %v49_v40 = vld [vmem:[%s827_s1 + $0x28] sm:$0xff] }
   0xe   :  { %v50_v41 = vld [vmem:[%s827_s1 + $0x30] sm:$0xff]  ;;  %v51_v42 = vld [vmem:[%s827_s1 + $0x38] sm:$0xff]  ;;  %v52_v43 = vld [vmem:[%s831_s3] sm:$0xff] }
   0xf   :  { %540 = vmatpush3.xpose.msk.msra.mxu0 %vm104_vm0, %v40_v6  ;;  %593 = vmatprep.mubr.msk.f32.mxu1 %vm314_vm1, %v52_v43  ;;  %v53_v12 = vld [vmem:[%s831_s3 + $0x8] sm:$0xff]  ;;  %v54_v13 = vld [vmem:[%s831_s3 + $0x10] sm:$0xff] }
  0x10   :  { %541 = vmatprep.subr.msk.mxu0 %vm104_vm0, %v39_v11  ;;  %71 = vperm.xlu0 %600, %v57_v15  }
  0x11   :  { %66 = vperm.xlu1 %601, %v56_v16  }
  0x13   :  { %542 = vmatpush3.xpose.msk.msra.mxu0 %vm104_vm0, %v39_v11 }
  0x14   :  { %543 = vmatprep.subr.msk.mxu0 %vm104_vm0, %v38_v14  ;;  %296 = vperm.xlu0 %600, %v290_v18  }
  0x15   :  { %301 = vperm.xlu1 %601, %v291_v19  }
  0x17   :  { %544 = vmatpush3.xpose.msk.msra.mxu0 %vm104_vm0, %v38_v14  ;;  %v55_v14 = vld [vmem:[%s831_s3 + $0x18] sm:$0xff] }
  0x18   :  { %545 = vmatprep.subr.msk.mxu0 %vm104_vm0, %v37_v17  ;;  %306 = vperm.xlu0 %600, %v292_v21  }
  0x19   :  { %311 = vperm.xlu1 %601, %v293_v22  }
  0x1b   :  { %546 = vmatpush3.xpose.msk.msra.mxu0 %vm104_vm0, %v37_v17 }
  0x1c   :  { %547 = vmatprep.subr.msk.mxu0 %vm104_vm0, %v36_v20  ;;  %422 = vperm.xlu0 %600, %v416_v24  }
  0x1d   :  { %427 = vperm.xlu1 %601, %v417_v25  }
  0x1f   :  { %548 = vmatpush3.xpose.msk.msra.mxu0 %vm104_vm0, %v36_v20 }
  0x20   :  { %549 = vmatprep.subr.msk.mxu0 %vm104_vm0, %v35_v23  ;;  %432 = vperm.xlu0 %600, %v418_v27  }
  0x21   :  { %437 = vperm.xlu1 %601, %v419_v28  }
  0x23   :  { %550 = vmatpush3.xpose.msk.msra.mxu0 %vm104_vm0, %v35_v23 }
  0x24   :  { %551 = vmatprep.subr.msk.mxu0 %vm104_vm0, %v34_v26  ;;  %456 = vperm.xlu0 %600, %v453_v30  }
  0x27   :  { %552 = vmatpush3.xpose.msk.msra.mxu0 %vm104_vm0, %v34_v26 }
  0x28   :  { %553 = vmatprep.subr.msk.mxu0 %vm104_vm0, %v33_v29 }
  0x2b   :  { %554 = vmatpush3.xpose.msk.msra.mxu0 %vm104_vm0, %v33_v29 }
  0x2c   :  { %555 = vmatprep.subr.msk.mxu0 %vm104_vm0, %v32_v31 }
  0x2f   :  { %556 = vmatpush3.xpose.msk.msra.mxu0 %vm104_vm0, %v32_v31 }
  0x30   :  { %557 = vmatprep.subr.msk.mxu0 %vm104_vm0, %v31_v32 }
  0x33   :  { %558 = vmatpush3.xpose.msk.msra.mxu0 %vm104_vm0, %v31_v32 }
  0x34   :  { %559 = vmatprep.subr.msk.mxu0 %vm104_vm0, %v30_v33 }
  0x37   :  { %560 = vmatpush3.xpose.msk.msra.mxu0 %vm104_vm0, %v30_v33 }
  0x38   :  { %561 = vmatprep.subr.msk.mxu0 %vm104_vm0, %v29_v34 }
  0x3b   :  { %562 = vmatpush3.xpose.msk.msra.mxu0 %vm104_vm0, %v29_v34 }
  0x3c   :  { %563 = vmatprep.subr.msk.mxu0 %vm104_vm0, %v28_v35 }
  0x3f   :  { %564 = vmatpush3.xpose.msk.msra.mxu0 %vm104_vm0, %v28_v35 }
  0x42   :  { %566 = vmatmul.mubr.msk.f32.vlgmr.msra.gmra.mxu0 %vm104_vm0, %v45_v36 }
  0x43   :  { %568 = vmatprep.mubr.msk.f32.mxu0 %vm104_vm0, %v46_v37 }
  0x46   :  { %569 = vmatmul.mubr.msk.f32.gmra.mxu0 %vm104_vm0, %v47_v38 }
  0x47   :  { %571 = vmatprep.mubr.msk.f32.mxu0 %vm104_vm0, %v48_v39 }
  0x4a   :  { %572 = vmatmul.mubr.msk.f32.gmra.mxu0 %vm104_vm0, %v49_v40 }
  0x4b   :  { %574 = vmatprep.mubr.msk.f32.mxu0 %vm104_vm0, %v50_v41  ;;  %v459_v41 = vlaneseq }
  0x4e   :  { %575 = vmatmul.mubr.msk.f32.gmra.mxu0 %vm104_vm0, %v51_v42 }
  0x7f   :  { %v102_v46 = vpop.permute.xlu0 %101 }
  0x80   :  { %v92_v48 = vpop.permute.xlu1 %91 }
  0x83   :  { %v97_v51 = vpop.permute.xlu0 %96 }
  0x84   :  { %v87_v53 = vpop.permute.xlu1 %86 }
  0x87   :  { %v82_v60 = vpop.permute.xlu0 %81 }
  0x88   :  { %v77_v63 = vpop.permute.xlu1 %76 }
  0x8b   :  { %v72_v4 = vpop.permute.xlu0 %71 }
  0x8c   :  { %v67_v7 = vpop.permute.xlu1 %66 }
  0x8f   :  { %v297_v15 = vpop.permute.xlu0 %296 }
  0x90   :  { %v302_v16 = vpop.permute.xlu1 %301 }
  0x93   :  { %v307_v17 = vpop.permute.xlu0 %306 }
  0x94   :  { %v312_v18 = vpop.permute.xlu1 %311 }
  0x97   :  { %v423_v23 = vpop.permute.xlu0 %422 }
  0x98   :  { %v428_v28 = vpop.permute.xlu1 %427 }
  0x9b   :  { %v433_v35 = vpop.permute.xlu0 %432 }
  0x9c   :  { %v438_v38 = vpop.permute.xlu1 %437 }
 0x102   :  { %v567_v44 = vpop.f32.mrf.mxu0 }
 0x103   :  { %v249_v5 = vadd.f32 %v567_v44, %v72_v4  ;;  %v460_v44 = vshrl.u32 %v459_v41, 7 }
 0x104   :  { %v243_v45 = vpop.f32.mrf.mxu0 }
 0x105   :  { %v244_v8 = vadd.f32 %v243_v45, %v67_v7  ;;  %v283_v10 = vmax.f32 %v249_v5, 0.0 }
 0x106   :  { %v570_v47 = vpop.f32.mrf.mxu0 }
 0x107   :  { %v259_v0 = vadd.f32 %v570_v47, %v82_v60  ;;  %v282_v11 = vmax.f32 %v244_v8, 0.0  ;;  %v461_v47 = vsub.s32 0, %v460_v44 }
 0x108   :  { %v253_v49 = vpop.f32.mrf.mxu0 }
 0x109   :  { %v254_v2 = vadd.f32 %v253_v49, %v77_v63  ;;  %v285_v6 = vmax.f32 %v259_v0, 0.0  ;;  %v457_v49 = vpop.permute.xlu0 %456 }
 0x10a   :  { %v573_v50 = vpop.f32.mrf.mxu0 }
 0x10b   :  { %v269_v57 = vadd.f32 %v573_v50, %v92_v48  ;;  %v284_v9 = vmax.f32 %v254_v2, 0.0 }
 0x10c   :  { %v263_v52 = vpop.f32.mrf.mxu0 }
 0x10d   :  { %v264_v61 = vadd.f32 %v263_v52, %v87_v53  ;;  %v287_v1 = vmax.f32 %v269_v57, 0.0 }
 0x10e   :  { %v576_v54 = vpop.f32.mrf.mxu0 }
 0x10f   :  { %v279_v55 = vadd.f32 %v576_v54, %v102_v46  ;;  %v286_v3 = vmax.f32 %v264_v61, 0.0 }
 0x110   :  { %v273_v56 = vpop.f32.mrf.mxu0 }
 0x111   :  { %v289_v58 = vmax.f32 %v279_v55, 0.0  ;;  %v274_v59 = vadd.f32 %v273_v56, %v97_v51  ;;  %v462_v51 = vrot.slane %v457_v49, %v461_v47 }
 0x113   :  { %v288_v62 = vmax.f32 %v274_v59, 0.0  ;;  %577 = vmatprep.subr.mxu1 %v289_v58 }
 0x114   :  { %578 = vmatpush3.msra.mxu1 %v289_v58 }
 0x115   :  { %579 = vmatprep.subr.mxu1 %v288_v62 }
 0x116   :  { %580 = vmatpush3.msra.mxu1 %v288_v62 }
 0x117   :  { %581 = vmatprep.subr.mxu1 %v287_v1 }
 0x118   :  { %582 = vmatpush3.msra.mxu1 %v287_v1 }
 0x119   :  { %583 = vmatprep.subr.mxu1 %v286_v3 }
 0x11a   :  { %584 = vmatpush3.msra.mxu1 %v286_v3 }
 0x11b   :  { %585 = vmatprep.subr.mxu1 %v285_v6 }
 0x11c   :  { %586 = vmatpush3.msra.mxu1 %v285_v6 }
 0x11d   :  { %587 = vmatprep.subr.mxu1 %v284_v9 }
 0x11e   :  { %588 = vmatpush3.msra.mxu1 %v284_v9 }
 0x11f   :  { %589 = vmatprep.subr.mxu1 %v283_v10 }
 0x120   :  { %590 = vmatpush3.msra.mxu1 %v283_v10 }
 0x121   :  { %591 = vmatprep.subr.mxu1 %v282_v11 }
 0x122   :  { %592 = vmatpush3.msra.mxu1 %v282_v11 }
 0x123   :  { %594 = vmatmul.mubr.msk.f32.vlgmr.msra.gmra.mxu1 %vm314_vm1, %v53_v12 }
 0x124   :  { %596 = vmatprep.mubr.msk.f32.mxu1 %vm314_vm1, %v54_v13 }
 0x127   :  { %597 = vmatmul.mubr.msk.f32.gmra.mxu1 %vm314_vm1, %v55_v14 }
 0x1e3   :  { %v595_v19 = vpop.f32.mrf.mxu1 }
 0x1e4   :  { %v399_v20 = vadd.f32 %v595_v19, %v302_v16 }
 0x1e5   :  { %v393_v21 = vpop.f32.mrf.mxu1 }
 0x1e6   :  { %v394_v22 = vadd.f32 %v393_v21, %v297_v15  ;;  %v413_v25 = vmax.f32 %v399_v20, 0.0 }
 0x1e7   :  { %v598_v24 = vpop.f32.mrf.mxu1 }
 0x1e8   :  { %v412_v26 = vmax.f32 %v394_v22, 0.0  ;;  %v409_v27 = vadd.f32 %v598_v24, %v312_v18  ;;  %v441_v32 = vmul.f32 %v428_v28, %v413_v25 }
 0x1e9   :  { %v403_v29 = vpop.f32.mrf.mxu1 }
 0x1ea   :  { %v440_v30 = vmul.f32 %v423_v23, %v412_v26  ;;  %v404_v31 = vadd.f32 %v403_v29, %v307_v17  ;;  %v415_v33 = vmax.f32 %v409_v27, 0.0 }
 0x1ec   :  { %v414_v34 = vmax.f32 %v404_v31, 0.0  ;;  %v444_v36 = vadd.f32 %v441_v32, %v440_v30  ;;  %v443_v39 = vmul.f32 %v438_v38, %v415_v33 }
 0x1ee   :  { %v442_v37 = vmul.f32 %v433_v35, %v414_v34 }
 0x1f0   :  { %v445_v40 = vadd.f32 %v444_v36, %v442_v37 }
 0x1f2   :  { %v446_v42 = vadd.f32 %v445_v40, %v443_v39 }
 0x1f4   :  { %v447_v43 = vrot.slane %v446_v42, 4 }
 0x1f6   :  { %v448_v45 = vadd.f32 %v447_v43, %v446_v42 }
 0x1f8   :  { %v449_v46 = vrot.slane %v448_v45, 2 }
 0x1fa   :  { %v450_v48 = vadd.f32 %v449_v46, %v448_v45 }
 0x1fc   :  { %v451_v50 = vrot.slane %v450_v48, 1 }
 0x1fe   :  { %v452_v52 = vadd.f32 %v451_v50, %v450_v48 }
 0x200   :  { %v463_v53 = vadd.f32 %v462_v51, %v452_v52 }
 0x202   :  { %464 = vst [vmem:[%s832_s7] sm:$0x1] %v463_v53 }

</bundles_post_ra>
